<compile_context>
chip_gen: v6e
topology: v6e:2x2x1
jax: 0.10.0
libtpu: 0.0.40
codegen_flags: <defaults>
</compile_context>

<pallas_src>
import numpy as np
import jax
import jax.numpy as jnp
from jax.experimental import pallas as pl
from jax.experimental.pallas import tpu as pltpu


# ---------------------------------------------------------------------------
# Sinusoid table (matches the PyTorch module's registered buffer)
# ---------------------------------------------------------------------------
def make_sinusoid_table(n_position: int, d_hid: int) -> jnp.ndarray:
    pos = np.arange(n_position, dtype=np.float64)[:, None]            # (P, 1)
    hid = np.arange(d_hid, dtype=np.int64)[None, :]                   # (1, D)
    angle = pos / np.power(10000.0, 2 * (hid // 2) / float(d_hid))    # (P, D)
    table = np.empty((n_position, d_hid), dtype=np.float64)
    table[:, 0::2] = np.sin(angle[:, 0::2])
    table[:, 1::2] = np.cos(angle[:, 1::2])
    return jnp.asarray(table[None, ...], dtype=jnp.float32)           # (1, P, D)


# ---------------------------------------------------------------------------
# Kernel body (shared by both layouts; pos broadcasts over the batch dim)
# ---------------------------------------------------------------------------
def _add_pos_kernel(x_ref, pos_ref, o_ref):
    o_ref[...] = (x_ref[...] + pos_ref[...]).astype(o_ref.dtype)


# ---------------------------------------------------------------------------
# Tiling helpers (padding-aware, generation-aware)
# ---------------------------------------------------------------------------
def _round_up(x: int, m: int) -> int:
    return -(-x // m) * m


def _native_sublane(itemsize: int) -> int:
    # Native (sublane, 128) tile height: f32 -> 8, bf16 -> 16, int8/fp8 -> 32.
    return max(8, 32 // max(int(itemsize), 1))


def _vmem_budget_and_limit():
    """Generation-aware double-buffered live-set budget and scoped-VMEM limit."""
    cap = 64 * 1024 * 1024
    try:
        info = pltpu.get_tpu_info()
        cap = int(getattr(info, "vmem_capacity_bytes", cap) or cap)
    except Exception:
        pass
    if cap <= 64 * 1024 * 1024:            # v7x: 64 MiB VMEM per TensorCore
        budget = 40 * 1024 * 1024
        limit = 56 * 1024 * 1024
    else:                                   # v5e / v6e: 128 MiB physical VMEM
        budget = 56 * 1024 * 1024
        limit = 80 * 1024 * 1024
    limit = max(16 * 1024 * 1024, min(limit, cap - 8 * 1024 * 1024))
    return budget, limit


def _min_tiles_for(total_bytes: int) -> int:
    # >=4 grid steps for big transfers so both v7x TensorCores get work;
    # tiny problems stay a single step (per-step overhead ~0.35 us).
    return 4 if total_bytes > 16 * 1024 * 1024 else 1


# ---------------------------------------------------------------------------
# Wrapper
# ---------------------------------------------------------------------------
def positional_encoding(x: jnp.ndarray, pos_table: jnp.ndarray,
                        *, donate_x: bool = False) -> jnp.ndarray:
    """x: (B, S, D); pos_table: (1, n_position, D). Returns x + pos_table[:, :S]."""
    B, S, D = x.shape
    _, P, Dp = pos_table.shape
    assert D == Dp, f"hidden dim mismatch: {D} vs {Dp}"
    assert S <= P, f"sequence length {S} exceeds n_position {P}"

    itemsize = x.dtype.itemsize
    sl = _native_sublane(itemsize)
    budget, vmem_limit = _vmem_budget_and_limit()
    total_bytes = (2 * B + 1) * S * D * itemsize          # x read + out write + pos read
    min_tiles = _min_tiles_for(total_bytes)

    cost = pl.CostEstimate(flops=B * S * D, transcendentals=0,
                           bytes_accessed=total_bytes)
    cparams = pltpu.CompilerParams(
        # TODO(synk): sweep pltpu.CORE_PARALLEL vs "parallel" on v7x.
        dimension_semantics=("parallel",),
        vmem_limit_bytes=int(vmem_limit),
    )
    io_alias = {0: 0} if donate_x else {}

    F = S * D
    use_flat = (D % 128 != 0) and (F % 128 == 0)

    if use_flat:
        # Lane-dense flat layout (B, S*D): full-width unmasked vector stores.
        # Used only when D is not lane-aligned but S*D is.  VMEM accounting is
        # sublane-padding-aware: a (B, T) block physically occupies
        # round_up(B, sl) rows, the (1, T) pos block occupies sl rows.
        x2 = x.reshape(B, F)                               # free reshape (row-major)
        pos2 = pos_table.reshape(1, P * D)                 # free reshape; first S*D
        pad_b = _round_up(B, sl)                           # elems == table[:, :S, :]
        per_lane = 2 * (2 * pad_b + sl) * itemsize         # 2 bufs x (x + out + pos)
        T = max(128, (budget // per_lane) // 128 * 128)
        if min_tiles > 1:
            T = min(T, max(128, (F // min_tiles) // 128 * 128))
        T = int(min(F, T))
        grid = (pl.cdiv(F, T),)

        out2 = pl.pallas_call(
            _add_pos_kernel,
            out_shape=jax.ShapeDtypeStruct((B, F), x.dtype),
            grid=grid,
            in_specs=[
                pl.BlockSpec((B, T), lambda t: (0, t)),    # x: full batch, flat tile t
                pl.BlockSpec((1, T), lambda t: (0, t)),    # pos: same flat tile, once per t
            ],
            out_specs=pl.BlockSpec((B, T), lambda t: (0, t)),
            compiler_params=cparams,
            cost_estimate=cost,
            input_output_aliases=io_alias,
        )(x2, pos2)
        return out2.reshape(B, S, D)

    # Sublane- and lane-dense 3-D path: block (B, R, D) tiled over the sequence.
    # Last block dim D equals the full array dim (legal for any D); R is a
    # multiple of the native sublane tile, so no VMEM padding waste even for
    # tiny batch.  Also serves as the hardened fallback for unaligned D
    # (tiled, so no whole-array VMEM block / OOM risk).
    lane_d = _round_up(D, 128)
    per_row = 2 * (2 * B + 1) * lane_d * itemsize          # 2 bufs x (x + out + pos) per seq row
    # TODO(synk): also tile the batch axis if B alone makes an sl-row block
    # exceed the VMEM budget (extremely large batch).
    if S < sl:
        # Tiny sequence: pre-slice the table so every block dim equals the
        # (small) array dims; single grid step.
        pos_in = pos_table[:, :S, :]
        R = S
    else:
        pos_in = pos_table
        R = max(sl, (budget // per_row) // sl * sl)
        if min_tiles > 1:
            R = min(R, max(sl, (S // min_tiles) // sl * sl))
        R = int(min((S // sl) * sl, R))
    grid = (pl.cdiv(S, R),)

    out = pl.pallas_call(
        _add_pos_kernel,
        out_shape=jax.ShapeDtypeStruct((B, S, D), x.dtype),
        grid=grid,
        in_specs=[
            pl.BlockSpec((B, R, D), lambda s: (0, s, 0)),  # x: full batch, seq tile s
            pl.BlockSpec((1, R, D), lambda s: (0, s, 0)),  # pos: same seq tile, once per s
        ],
        out_specs=pl.BlockSpec((B, R, D), lambda s: (0, s, 0)),
        compiler_params=cparams,
        cost_estimate=cost,
        input_output_aliases=io_alias,
    )(x, pos_in)
    return out


if __name__ == "__main__":
    N_POSITION = 200
    key = jax.random.PRNGKey(0)

    # Primary demo shape (matches the module defaults): batch=2, seq=8, hidden=32.
    B, S, D = 2, 8, 32
    x = jax.random.normal(key, (B, S, D), dtype=jnp.float32)
    pos_table = make_sinusoid_table(N_POSITION, D)
    out = jax.block_until_ready(positional_encoding(x, pos_table))
    ref = x + pos_table[:, :S, :]
    np.testing.assert_allclose(np.asarray(out), np.asarray(ref), rtol=1e-6, atol=1e-6)

    # Extra small checks exercising the sublane-dense 3-D path and the
    # hardened unaligned-D fallback (partial edge tiles).
    for (b2, s2, d2) in [(2, 16, 128), (3, 12, 40)]:
        k2 = jax.random.fold_in(key, s2 * d2)
        x2 = jax.random.normal(k2, (b2, s2, d2), dtype=jnp.float32)
        pt2 = make_sinusoid_table(N_POSITION, d2)
        o2 = jax.block_until_ready(positional_encoding(x2, pt2))
        r2 = x2 + pt2[:, :s2, :]
        np.testing.assert_allclose(np.asarray(o2), np.asarray(r2), rtol=1e-6, atol=1e-6)

    print("KERNEL_OK")
</pallas_src>

<mosaic_0001>
module attributes {stable_mosaic.version = 11 : i64} {
  func.func @_add_pos_kernel(%arg0: i32, %arg1: memref<2x256xf32, #tpu.memory_space<vmem>>, %arg2: memref<1x256xf32, #tpu.memory_space<vmem>>, %arg3: memref<2x256xf32, #tpu.memory_space<vmem>>) attributes {dimension_semantics = [#tpu.dimension_semantics<parallel>], iteration_bounds = array<i64: 1>, scalar_prefetch = 0 : i64, scratch_operands = 0 : i64, tpu.core_type = #tpu.core_type<tc>, window_params = [{transform_indices = @transform_0, window_bounds = array<i64: 2, 256>}, {transform_indices = @transform_1, window_bounds = array<i64: 1, 256>}, {transform_indices = @transform_2, window_bounds = array<i64: 2, 256>}]} {
    %c0 = arith.constant 0 : index
    %c0_0 = arith.constant 0 : index
    %0 = vector.load %arg1[%c0, %c0_0] : memref<2x256xf32, #tpu.memory_space<vmem>>, vector<2x256xf32>
    %c0_1 = arith.constant 0 : index
    %c0_2 = arith.constant 0 : index
    %1 = vector.load %arg2[%c0_1, %c0_2] : memref<1x256xf32, #tpu.memory_space<vmem>>, vector<1x256xf32>
    %2 = vector.broadcast %1 : vector<1x256xf32> to vector<2x256xf32>
    %3 = arith.addf %0, %2 : vector<2x256xf32>
    %c0_3 = arith.constant 0 : index
    %c0_4 = arith.constant 0 : index
    %4 = vector.load %arg3[%c0_3, %c0_4] : memref<2x256xf32, #tpu.memory_space<vmem>>, vector<2x256xf32>
    tpu.vector_store %arg3[%c0_3, %c0_4], %3 {strides = array<i32>} : memref<2x256xf32, #tpu.memory_space<vmem>>, vector<2x256xf32>,
    return
  }
  func.func @transform_0(%arg0: i32) -> (i32, i32) {
    %c0_i32 = arith.constant 0 : i32
    %c0_i32_0 = arith.constant 0 : i32
    return %c0_i32, %arg0 : i32, i32
  }
  func.func @transform_1(%arg0: i32) -> (i32, i32) {
    %c0_i32 = arith.constant 0 : i32
    %c0_i32_0 = arith.constant 0 : i32
    return %c0_i32, %arg0 : i32, i32
  }
  func.func @transform_2(%arg0: i32) -> (i32, i32) {
    %c0_i32 = arith.constant 0 : i32
    %c0_i32_0 = arith.constant 0 : i32
    return %c0_i32, %arg0 : i32, i32
  }
}

</mosaic_0001>

<bundles_post_ra>
// kernel: tpu_custom_call.1
= control target key start
LH: loop header
LB: loop body
LE: loop exit
PB: predicated region body
PF: predicated region fallthrough
CT: control target
= control target key end

     0   :  { %7 = vsyncpa [#allocation3], 0  ;;  %s172_s0 = inlined_call_operand.hbm [shape: f32[2,256], index: 0, kind: input, shape index: {}]   ;;  %s173_s1 = inlined_call_operand.hbm [shape: f32[1,6400], index: 1, kind: input, shape index: {}]   ;;  %s174_s2 = inlined_call_operand.hbm [shape: f32[2,256], index: 2, kind: output, shape index: {}]  }
   0x1   :  { %8 = vsyncpa [#allocation6], 0 }
   0x2   :  { %9 = vsyncpa [#allocation4], 0  ;;  %s144_s9 = smov [#allocation2]   ;;  %s145_s11 = smov [#allocation5]  }
   0x3   :  { %s16_s10 = sshll.u32 %s144_s9, 4  ;;  %s26_s12 = sshll.u32 %s145_s11, 4  ;;  %s17_s10 = int_to_ptr.vmem [resolvable:$true] %s16_s10  ;;  %s27_s12 = int_to_ptr.vmem [resolvable:$true] %s26_s12 }
   0x4   :  { %s86_s13 = scalar_lea.vmem %s17_s10, 64  ;;  %p91_p1 = scmp.lt.s32.totalorder %s17_s10, %s17_s10 }
   0x5   :  { %p87_p0 = scmp.ne.s32.totalorder %s17_s10, %s86_s13  ;;  %p92_p2 = scmp.lt.s32.totalorder %s86_s13, %s86_s13 }
   0x7   :  { %p93_p3 = por %p92_p2, %p91_p1 }
   0x9   :  { %p94_p4 = pnand %p93_p3, %p87_p0 }
   0xb   :  { %97 = shalt.err (!%p94_p4)
}
   0xc   :  { %19 = dma.hbm_to_vmem [thread:$0]  %s172_s0, 64, %s17_s10, [#allocation3]  }
   0xd   :  { %s106_s16 = scalar_lea.vmem %s27_s12, 32  ;;  %p111_p6 = scmp.lt.s32.totalorder %s27_s12, %s27_s12 }
   0xe   :  { %p107_p5 = scmp.ne.s32.totalorder %s27_s12, %s106_s16  ;;  %p112_p7 = scmp.lt.s32.totalorder %s106_s16, %s106_s16 }
  0x10   :  { %p113_p8 = por %p112_p7, %p111_p6 }
  0x12   :  { %p114_p9 = pnand %p113_p8, %p107_p5 }
  0x14   :  { %117 = shalt.err (!%p114_p9)
}
  0x15   :  { %29 = dma.hbm_to_vmem [thread:$0]  %s173_s1, 32, %s27_s12, [#allocation6]  }
  0x16   :  { %138 = dma.done.wait [#allocation3], 64  }
  0x17   :  { %139 = vsyncadd [#allocation3], 4294967232 }
  0x18   :  { %140 = dma.done.wait [#allocation6], 32  }
  0x19   :  { %141 = vsyncadd [#allocation6], 4294967264  ;;  %v39_v0 = vlaneseq  ;;  %v146_v1 = vmov 1983009808   ;;  %v37_v7 = vld [vmem:[#allocation5] sm:$0x3] }
  0x1a   :  { %v49_v2 = vunpack.c.l.s4 %v146_v1  ;;  %v36_v12 = vld [vmem:[#allocation2] sm:$0xf]  ;;  %s147_s0 = smov [#allocation7]  }
  0x1b   :  { %v40_v3 = vshrl.u32 %v39_v0, 7  ;;  %s64_s19 = sshll.u32 %s147_s0, 4  ;;  %s65_s19 = int_to_ptr.vmem [resolvable:$true] %s64_s19 }
  0x1c   :  { %v50_v6 = vunpack.c.0.s8 %v49_v2  ;;  %s118_s1 = scalar_lea.vmem %s65_s19, 64  ;;  %p123_p11 = scmp.lt.s32.totalorder %s65_s19, %s65_s19 }
  0x1d   :  { %v41_v4 = vsub.s32 0, %v40_v3  ;;  %v45_v5 = vsub.s32 1, %v40_v3  ;;  %p119_p10 = scmp.ne.s32.totalorder %s65_s19, %s118_s1  ;;  %p124_p12 = scmp.lt.s32.totalorder %s118_s1, %s118_s1 }
  0x1e   :  { %v53_v10 = vsub.s32 %v50_v6, %v40_v3 }
  0x1f   :  { %v42_v8 = vrot.slane %v37_v7, %v41_v4  ;;  %v46_v9 = vrot.slane %v37_v7, %v45_v5  ;;  %p125_p13 = por %p124_p12, %p123_p11 }
  0x21   :  { %v47_v11 = vcombine.low %v42_v8, %v46_v9  ;;  %p126_p0 = pnand %p125_p13, %p119_p10 }
  0x23   :  { %v54_v13 = vrot.slane %v47_v11, %v53_v10 }
  0x25   :  { %v56_v14 = vadd.f32 %v54_v13, %v36_v12 }
  0x27   :  { %57 = vst [vmem:[#allocation7] sm:$0xf] %v56_v14 }
  0x28   :  { %129 = shalt.err (!%p126_p0)
}
  0x29   :  { %67 = dma.vmem_to_hbm [thread:$0]  %s65_s19, 64, %s174_s2, [#allocation4]  }
  0x2a   :  { %142 = dma.done.wait [#allocation4], 64  }
  0x2b   :  { %143 = vsyncadd [#allocation4], 4294967232 }
  0x2c   :  { %71 = vsyncpa [#allocation3], 1 }
  0x2d   :  { %72 = vsyncpa [#allocation6], 1 }
  0x2e   :  { %73 = vsyncpa [#allocation4], 1 }

</bundles_post_ra>
